<compile_context>
chip_gen: v7x
topology: tpu7x:2x2x1
jax: 0.10.0
libtpu: 0.0.40
codegen_flags: <defaults>
</compile_context>

<pallas_src>
import functools

import jax
import jax.numpy as jnp
from jax import lax
from jax.experimental import pallas as pl
from jax.experimental.pallas import tpu as pltpu

BN_EPS = 1e-5

CONV_STRIDES = [[1, 2], [3, 1]]        # module defaults (time, freq)
CONV_KERNEL_SIZES = [[7, 7], [7, 7]]   # module defaults


# ---------------------------------------------------------------------------
# per-chip sizing
# ---------------------------------------------------------------------------
def _vmem_capacity_bytes():
    try:
        info = pltpu.get_tpu_info()
        for attr in ("vmem_capacity_bytes", "vmem_bytes", "vmem_size_bytes"):
            v = getattr(info, attr, None)
            if isinstance(v, int) and v > 0:
                return v
    except Exception:
        pass
    try:
        kind = jax.devices()[0].device_kind.lower()
        if "v7" in kind:
            return 64 * 1024 * 1024
        return 128 * 1024 * 1024
    except Exception:
        return 64 * 1024 * 1024


_VMEM_CAP = _vmem_capacity_bytes()
if _VMEM_CAP >= 100 * 1024 * 1024:     # v5e / v6e (128 MiB VMEM)
    VMEM_LIMIT = 96 * 1024 * 1024
    ROW_TILE_CAP = 512
else:                                  # v7x (64 MiB VMEM)
    VMEM_LIMIT = 48 * 1024 * 1024
    ROW_TILE_CAP = 256
COL_TILE_CAP = 1024                    # output-column tile for the input projection
TIME_CHUNK_CAP = 32                    # bf16 gates halve the per-chunk VMEM footprint


# ---------------------------------------------------------------------------
# small static helpers
# ---------------------------------------------------------------------------
def _round_up(n, m):
    return ((n + m - 1) // m) * m


def _divisor_tile(n, cap, mult):
    best = mult
    d = mult
    lim = min(cap, n)
    while d <= lim:
        if n % d == 0:
            best = d
        d += mult
    return best


def _pick_rows_tile(n, cap):
    """Row-tile: full array if small; else the largest x16 divisor; else pad (rare)."""
    if n <= cap:
        return n, n
    for d in range(cap - cap % 16, 0, -16):
        if n % d == 0:
            return d, n
    t = cap - cap % 16
    return t, _round_up(n, t)


def _pick_time_chunk(t, cap):
    """Time-chunk: full T if small; a good divisor; else pad + in-kernel masking."""
    if t <= cap:
        return t, t
    best = 1
    for d in range(cap, 0, -1):
        if t % d == 0:
            best = d
            break
    if best >= max(8, cap // 2):
        return best, t
    return cap, _round_up(t, cap)


def _cparams(dim_sem):
    return pltpu.CompilerParams(dimension_semantics=dim_sem,
                                vmem_limit_bytes=VMEM_LIMIT)


# ---------------------------------------------------------------------------
# Kernel 1: conv-as-matmul (bf16 patches @ bf16 W, f32 acc) + per-tile sum/sumsq
#           (per-tile partials -> grid axis stays 'parallel' / megacore-shardable)
# ---------------------------------------------------------------------------
def conv_mm_stats_kernel(p_ref, w_ref, y_ref, stats_ref):
    y = jnp.dot(p_ref[...], w_ref[...], preferred_element_type=jnp.float32)
    y_ref[...] = y.astype(y_ref.dtype)
    # Zero-padded rows contribute exactly 0 to both sums (no bias, zero patches),
    # so no row masking is needed.
    s1 = jnp.sum(y, axis=0, keepdims=True)
    s2 = jnp.sum(y * y, axis=0, keepdims=True)
    stats_ref[...] = jnp.concatenate([s1, s2], axis=0)[None]


# ---------------------------------------------------------------------------
# Kernel 2: BN apply (precomputed scale/shift) + Hardtanh(0, 20), tiled over rows
# ---------------------------------------------------------------------------
def bn_act_kernel(y_ref, s_ref, t_ref, o_ref):
    y = y_ref[...].astype(jnp.float32)
    o_ref[...] = jnp.clip(y * s_ref[...] + t_ref[...], 0.0, 20.0).astype(o_ref.dtype)


# ---------------------------------------------------------------------------
# Kernel 3: BN-fused hoisted input projection  (x * s + t) @ [Wih_fwd | Wih_bwd]
#           bf16 operands, f32 accumulation, bf16 gate output
# ---------------------------------------------------------------------------
def bn_proj_kernel(x_ref, s_ref, t_ref, w_ref, o_ref, *, apply_bn):
    x = x_ref[...].astype(jnp.float32)
    if apply_bn:
        x = x * s_ref[...] + t_ref[...]
    o_ref[...] = jnp.dot(x.astype(jnp.bfloat16), w_ref[...],
                         preferred_element_type=jnp.float32).astype(o_ref.dtype)


# ---------------------------------------------------------------------------
# Kernels 4/5: LSTM time recurrence (input projection hoisted).  One
# (B,H)@(H,4H) bf16 matmul per step; gate order i,f,g,o; h/c carried in f32
# VMEM scratch across the 'arbitrary' time-chunk grid.
# ---------------------------------------------------------------------------
def _lstm_cell(gates, c_prev, hidden):
    i_g = jax.nn.sigmoid(gates[:, 0 * hidden:1 * hidden])
    f_g = jax.nn.sigmoid(gates[:, 1 * hidden:2 * hidden])
    g_g = jnp.tanh(gates[:, 2 * hidden:3 * hidden])
    o_g = jax.nn.sigmoid(gates[:, 3 * hidden:4 * hidden])
    c_new = f_g * c_prev + i_g * g_g
    h_new = o_g * jnp.tanh(c_new)
    return h_new, c_new


def lstm_fwd_kernel(gx_ref, whh_ref, o_ref, h_sc, c_sc, *, hidden, chunk, unroll):
    # Forward direction needs no tail masking: padded time steps come after every
    # real output has already been written.
    @pl.when(pl.program_id(0) == 0)
    def _():
        h_sc[...] = jnp.zeros_like(h_sc)
        c_sc[...] = jnp.zeros_like(c_sc)

    def step(t, carry):
        g = jnp.dot(h_sc[...].astype(jnp.bfloat16), whh_ref[...],
                    preferred_element_type=jnp.float32) + gx_ref[t].astype(jnp.float32)
        h_new, c_new = _lstm_cell(g, c_sc[...], hidden)
        h_sc[...] = h_new
        c_sc[...] = c_new
        o_ref[t] = h_new.astype(o_ref.dtype)
        return carry

    lax.fori_loop(0, chunk, step, 0, unroll=unroll)


def lstm_bwd_sum_stats_kernel(gx_ref, whh_ref, hf_ref, o_ref, stats_ref,
                              h_sc, c_sc, *, hidden, chunk, unroll, t_valid, t_pad):
    # Backward direction: chunk order reversed by the index_map, step order reversed
    # here.  The bidirectional sum (o = h_fwd + h_bwd) is fused into the store and the
    # BatchNorm1d sum/sumsq of the layer output is accumulated into a grid-resident
    # (2, H) block, so the next layer needs no separate stats pass.
    nT = pl.num_programs(0)
    c_idx = pl.program_id(0)
    t0 = (nT - 1 - c_idx) * chunk          # global time of row 0 of this chunk
    need_mask = (t_valid != t_pad)         # static: only when T was padded

    @pl.when(c_idx == 0)
    def _():
        h_sc[...] = jnp.zeros_like(h_sc)
        c_sc[...] = jnp.zeros_like(c_sc)
        stats_ref[...] = jnp.zeros_like(stats_ref)

    def step(k, carry):
        t = chunk - 1 - k
        g = jnp.dot(h_sc[...].astype(jnp.bfloat16), whh_ref[...],
                    preferred_element_type=jnp.float32) + gx_ref[t].astype(jnp.float32)
        h_new, c_new = _lstm_cell(g, c_sc[...], hidden)
        if need_mask:
            valid = (t0 + t) < t_valid
            h_new = jnp.where(valid, h_new, h_sc[...])
            c_new = jnp.where(valid, c_new, c_sc[...])
        h_sc[...] = h_new
        c_sc[...] = c_new
        o_ref[t] = (hf_ref[t].astype(jnp.float32) + h_new).astype(o_ref.dtype)
        return carry

    lax.fori_loop(0, chunk, step, 0, unroll=unroll)

    o_blk = o_ref[...].astype(jnp.float32)           # (chunk, B, H)
    if need_mask:
        tmask = (t0 + lax.broadcasted_iota(jnp.int32, (chunk, 1, 1), 0)) < t_valid
        o_blk = jnp.where(tmask, o_blk, 0.0)
    s1 = jnp.sum(o_blk, axis=(0, 1)).reshape(1, hidden)
    s2 = jnp.sum(o_blk * o_blk, axis=(0, 1)).reshape(1, hidden)
    stats_ref[...] += jnp.concatenate([s1, s2], axis=0)


# ---------------------------------------------------------------------------
# Wrappers
# ---------------------------------------------------------------------------
def conv_layer(patches, cp):
    """patches: (P, K) -> (P, C) after conv + BatchNorm2d(train) + Hardtanh(0,20)."""
    P, K = patches.shape
    C = cp["c_out"]
    Cp = _round_up(C, 128)                 # lane-dense output channels
    TP, Pp = _pick_rows_tile(P, ROW_TILE_CAP)
    nP = Pp // TP

    patches_b = patches.astype(jnp.bfloat16)
    if Pp > P:
        patches_b = jnp.pad(patches_b, ((0, Pp - P), (0, 0)))
    w_b = jnp.pad(cp["w"], ((0, 0), (0, Cp - C))).astype(jnp.bfloat16)
    gamma = jnp.pad(cp["gamma"], ((0, 0), (0, Cp - C)), constant_values=1.0)
    beta = jnp.pad(cp["beta"], ((0, 0), (0, Cp - C)))

    y, stats_p = pl.pallas_call(
        conv_mm_stats_kernel,
        grid=(nP,),
        in_specs=[pl.BlockSpec((TP, K), lambda i: (i, 0)),
                  pl.BlockSpec((K, Cp), lambda i: (0, 0))],
        out_specs=[pl.BlockSpec((TP, Cp), lambda i: (i, 0)),
                   pl.BlockSpec((1, 2, Cp), lambda i: (i, 0, 0))],
        out_shape=[jax.ShapeDtypeStruct((Pp, Cp), jnp.bfloat16),
                   jax.ShapeDtypeStruct((nP, 2, Cp), jnp.float32)],
        compiler_params=_cparams(("parallel",)),
    )(patches_b, w_b)

    # tiny per-channel reduction + BN fold (train-mode batch stats, biased var)
    stats = jnp.sum(stats_p, axis=0)
    mean = stats[0] / P
    var = jnp.maximum(stats[1] / P - mean * mean, 0.0)
    scale = gamma[0] * lax.rsqrt(var + BN_EPS)
    shift = beta[0] - mean * scale

    out = pl.pallas_call(
        bn_act_kernel,
        grid=(nP,),
        in_specs=[pl.BlockSpec((TP, Cp), lambda i: (i, 0)),
                  pl.BlockSpec((1, Cp), lambda i: (0, 0)),
                  pl.BlockSpec((1, Cp), lambda i: (0, 0))],
        out_specs=pl.BlockSpec((TP, Cp), lambda i: (i, 0)),
        out_shape=jax.ShapeDtypeStruct((Pp, Cp), jnp.bfloat16),
        compiler_params=_cparams(("parallel",)),
    )(y, scale[None, :], shift[None, :])

    return out[:P, :C]


def batch_rnn_layer(x_seq, lp, bn_stats, n_valid_rows, t_valid, time_chunk):
    """One BatchRNN layer on a (T_pad, B, F) bf16 sequence.

    Returns (output (T_pad, B, H) bf16, per-feature sum/sumsq (2, H) of the valid output
    rows — consumed as the next layer's BatchNorm1d statistics)."""
    Tp, B, F = x_seq.shape
    H = lp["hidden"]
    G8 = 8 * H

    # ----- BatchNorm1d (train-mode) folded into scale/shift; stats come from the
    #       previous layer's fused accumulator (layer 0 has normalization=None) -----
    apply_bn = bn_stats is not None
    if apply_bn:
        mean = bn_stats[0] / n_valid_rows
        var = jnp.maximum(bn_stats[1] / n_valid_rows - mean * mean, 0.0)
        s = lp["bn_gamma"][0] * lax.rsqrt(var + BN_EPS)
        t = lp["bn_beta"][0] - mean * s
        s, t = s[None, :], t[None, :]
    else:
        s = jnp.ones((1, F), jnp.float32)
        t = jnp.zeros((1, F), jnp.float32)

    # ----- hoisted input projection: (x*s + t) @ [Wih_fwd | Wih_bwd], bf16 MXU -----
    rows = Tp * B
    TR, Rp = _pick_rows_tile(rows, ROW_TILE_CAP)
    nR = Rp // TR
    x2d = x_seq.reshape(rows, F)
    if Rp > rows:                                   # rare fallback (no nice divisor)
        x2d = jnp.pad(x2d, ((0, Rp - rows), (0, 0)))
    TCcol = _divisor_tile(G8, COL_TILE_CAP, 128)
    nCol = G8 // TCcol
    wih = lp["wih_cat"].astype(jnp.bfloat16)

    proj = functools.partial(bn_proj_kernel, apply_bn=apply_bn)
    gates2d = pl.pallas_call(
        proj,
        grid=(nCol, nR),                            # column axis outer -> Wih block resident
        in_specs=[pl.BlockSpec((TR, F), lambda c, r: (r, 0)),
                  pl.BlockSpec((1, F), lambda c, r: (0, 0)),
                  pl.BlockSpec((1, F), lambda c, r: (0, 0)),
                  pl.BlockSpec((F, TCcol), lambda c, r: (0, c))],
        out_specs=pl.BlockSpec((TR, TCcol), lambda c, r: (r, c)),
        out_shape=jax.ShapeDtypeStruct((Rp, G8), jnp.bfloat16),
        compiler_params=_cparams(("parallel", "parallel")),
    )(x2d, s, t, wih)
    if Rp > rows:
        gates2d = gates2d[:rows]
    gates = gates2d.reshape(Tp, B, G8)              # free reshape on the common path

    # ----- time recurrence, tiled over T chunks -----
    TT = time_chunk
    nT = Tp // TT
    unroll = min(TT, 4)
    whh_f = lp["whh_f"].astype(jnp.bfloat16)
    whh_b = lp["whh_b"].astype(jnp.bfloat16)

    fwd_kern = functools.partial(lstm_fwd_kernel, hidden=H, chunk=TT, unroll=unroll)
    h_fwd = pl.pallas_call(
        fwd_kern,
        grid=(nT,),
        in_specs=[pl.BlockSpec((TT, B, 4 * H), lambda c: (c, 0, 0)),
                  pl.BlockSpec((H, 4 * H), lambda c: (0, 0))],
        out_specs=pl.BlockSpec((TT, B, H), lambda c: (c, 0, 0)),
        out_shape=jax.ShapeDtypeStruct((Tp, B, H), jnp.bfloat16),
        scratch_shapes=[pltpu.VMEM((B, H), jnp.float32),
                        pltpu.VMEM((B, H), jnp.float32)],
        compiler_params=_cparams(("arbitrary",)),
    )(gates, whh_f)

    bwd_kern = functools.partial(lstm_bwd_sum_stats_kernel, hidden=H, chunk=TT,
                                 unroll=unroll, t_valid=t_valid, t_pad=Tp)
    # NOTE: the bwd gate block is exactly 4H wide over the 8H gates array, so block
    # column index 1 selects the backward-direction gates.  Keep these in sync.
    out, stats = pl.pallas_call(
        bwd_kern,
        grid=(nT,),
        in_specs=[pl.BlockSpec((TT, B, 4 * H), lambda c: (nT - 1 - c, 0, 1)),
                  pl.BlockSpec((H, 4 * H), lambda c: (0, 0)),
                  pl.BlockSpec((TT, B, H), lambda c: (nT - 1 - c, 0, 0))],
        out_specs=[pl.BlockSpec((TT, B, H), lambda c: (nT - 1 - c, 0, 0)),
                   pl.BlockSpec((2, H), lambda c: (0, 0))],
        out_shape=[jax.ShapeDtypeStruct((Tp, B, H), jnp.bfloat16),
                   jax.ShapeDtypeStruct((2, H), jnp.float32)],
        scratch_shapes=[pltpu.VMEM((B, H), jnp.float32),
                        pltpu.VMEM((B, H), jnp.float32)],
        compiler_params=_cparams(("arbitrary",)),
    )(gates, whh_b, h_fwd)

    return out, stats


# ---------------------------------------------------------------------------
# Glue: NHWC im2col (pure data movement), parameters, full forward pass
# ---------------------------------------------------------------------------
def im2col_nhwc(x, ksize, stride, pad):
    """x: (B, H, W, C) -> patches (B*Ho*Wo, Kh*Kw*C) with features ordered (kh, kw, c)."""
    B, Hin, Win, C = x.shape
    Kh, Kw = ksize
    Sh, Sw = stride
    Ph, Pw = pad
    xp = jnp.pad(x, ((0, 0), (Ph, Ph), (Pw, Pw), (0, 0)))
    Ho = (Hin + 2 * Ph - Kh) // Sh + 1
    Wo = (Win + 2 * Pw - Kw) // Sw + 1
    cols = []
    for kh in range(Kh):
        for kw in range(Kw):
            cols.append(xp[:, kh:kh + Sh * Ho:Sh, kw:kw + Sw * Wo:Sw, :])
    patches = jnp.concatenate(cols, axis=-1)           # (B, Ho, Wo, Kh*Kw*C)
    return patches.reshape(B * Ho * Wo, Kh * Kw * C), Ho, Wo


def make_params(key, num_input_channels, input_height, conv_num_features,
                rnn_hidden_size, rnn_nb_layers):
    keys = iter(jax.random.split(key, 4 * (len(conv_num_features) + rnn_nb_layers) + 4))
    params = {"conv": [], "rnn": []}
    c_in = num_input_channels
    f_dim = input_height
    for nf, ks, cs in zip(conv_num_features, CONV_KERNEL_SIZES, CONV_STRIDES):
        kh, kw = ks
        params["conv"].append(dict(
            # Conv2d weight as (Kh*Kw*Cin, Cout); patch features ordered (kh, kw, c).
            # Conv bias omitted: train-mode BatchNorm2d follows, so it cancels exactly.
            w=0.1 * jax.random.normal(next(keys), (kh * kw * c_in, nf), jnp.float32),
            gamma=jnp.ones((1, nf), jnp.float32),     # BatchNorm affine defaults
            beta=jnp.zeros((1, nf), jnp.float32),
            ks=(kh, kw), cs=tuple(cs), c_out=nf,
        ))
        c_in = nf
        f_dim = (f_dim + 2 * ((kw - 1) // 2) - kw) // cs[1] + 1
    rnn_input_size = c_in * f_dim              # == after_conv_size[1] * after_conv_size[3]
    H = rnn_hidden_size
    assert (4 * H) % 128 == 0, "4*hidden must be a multiple of 128 for lane tiling"
    in_size = rnn_input_size
    scale = 1.0 / (H ** 0.5)
    for layer in range(rnn_nb_layers):
        # wih_cat columns: [fwd: i,f,g,o | bwd: i,f,g,o]; whh_* columns: [i,f,g,o]
        lp = dict(
            wih_cat=scale * jax.random.normal(next(keys), (in_size, 8 * H), jnp.float32),
            whh_f=scale * jax.random.normal(next(keys), (H, 4 * H), jnp.float32),
            whh_b=scale * jax.random.normal(next(keys), (H, 4 * H), jnp.float32),
            hidden=H,
        )
        if layer > 0:   # layer 0 of makeRnn has normalization=None
            lp["bn_gamma"] = jnp.ones((1, in_size), jnp.float32)
            lp["bn_beta"] = jnp.zeros((1, in_size), jnp.float32)
        params["rnn"].append(lp)
        in_size = H     # bidirectional outputs are summed -> H features
    return params


def deepspeech2_forward(params, x):
    """x: (B, T, F, C) -> (B, T', 1, H)  (features_lens omitted, as when called w/o lens)."""
    B = x.shape[0]
    # The module permutes (B,T,F,C) -> NCHW; we keep NHWC = the input layout as-is,
    # so conv spatial dims are (T, F) and the channel dim stays lane-dense throughout.
    cur = x
    for cp in params["conv"]:
        kh, kw = cp["ks"]
        pad = ((kh - 1) // 2, (kw - 1) // 2)
        # TODO(synk): fold this patch extraction into the conv kernel (manual DMA gathers).
        patches, Ho, Wo = im2col_nhwc(cur, cp["ks"], cp["cs"], pad)
        out2d = conv_layer(patches, cp)                      # (B*Ho*Wo, C_out) bf16
        cur = out2d.reshape(B, Ho, Wo, cp["c_out"])          # stay NHWC

    _, T2, F2, C2 = cur.shape
    x_seq = jnp.transpose(cur, (1, 0, 2, 3)).reshape(T2, B, F2 * C2)   # (T', B, F'*C)

    T_real = T2
    TT, T_pad = _pick_time_chunk(T_real, TIME_CHUNK_CAP)
    if T_pad > T_real:
        x_seq = jnp.pad(x_seq, ((0, T_pad - T_real), (0, 0), (0, 0)))
    n_valid_rows = T_real * B

    stats = None
    for li, lp in enumerate(params["rnn"]):
        x_seq, stats = batch_rnn_layer(
            x_seq, lp,
            bn_stats=stats if li > 0 else None,
            n_valid_rows=n_valid_rows,
            t_valid=T_real,
            time_chunk=TT)

    out = x_seq[:T_real].astype(jnp.float32)
    # pad_packed_sequence(batch_first=True) then unsqueeze(2)
    return jnp.transpose(out, (1, 0, 2))[:, :, None, :]


if __name__ == "__main__":
    key = jax.random.PRNGKey(0)
    k_x, k_p = jax.random.split(key)

    # small shapes: batch=2, time=12, input_height(freq)=16, in_channels=4
    B, T, F, C = 2, 12, 16, 4
    x = jax.random.normal(k_x, (B, T, F, C), jnp.float32)

    params = make_params(
        k_p,
        num_input_channels=C,
        input_height=F,
        conv_num_features=[8, 8],   # scaled-down from default [32, 32]
        rnn_hidden_size=32,         # scaled-down from default 768
        rnn_nb_layers=2,            # scaled-down from default 5 (same layer structure)
    )

    out = jax.block_until_ready(deepspeech2_forward(params, x))

    # time stride: conv strides (1, then 3) -> T' = ceil(12 / 3) = 4; output dim = hidden
    assert out.shape == (B, 4, 1, 32), out.shape
    assert out.dtype == jnp.float32
    assert bool(jnp.all(jnp.isfinite(out)))
    print("KERNEL_OK")
</pallas_src>

<mosaic_0001>
module attributes {stable_mosaic.version = 11 : i64} {
  func.func @conv_mm_stats_kernel(%arg0: i32, %arg1: memref<192x196xbf16, #tpu.memory_space<vmem>>, %arg2: memref<196x128xbf16, #tpu.memory_space<vmem>>, %arg3: memref<192x128xbf16, #tpu.memory_space<vmem>>, %arg4: memref<1x2x128xf32, #tpu.memory_space<vmem>>) attributes {dimension_semantics = [#tpu.dimension_semantics<parallel>], iteration_bounds = array<i64: 1>, scalar_prefetch = 0 : i64, scratch_operands = 0 : i64, tpu.core_type = #tpu.core_type<tc>, window_params = [{transform_indices = @transform_0, window_bounds = array<i64: 192, 196>}, {pipeline_mode = #tpu.pipeline_mode<synchronous>, transform_indices = @transform_1, window_bounds = array<i64: 196, 128>}, {transform_indices = @transform_2, window_bounds = array<i64: 192, 128>}, {transform_indices = @transform_3, window_bounds = array<i64: 1, 2, 128>}]} {
    %c0 = arith.constant 0 : index
    %c0_0 = arith.constant 0 : index
    %0 = vector.load %arg1[%c0, %c0_0] : memref<192x196xbf16, #tpu.memory_space<vmem>>, vector<192x196xbf16>
    %c0_1 = arith.constant 0 : index
    %c0_2 = arith.constant 0 : index
    %1 = vector.load %arg2[%c0_1, %c0_2] : memref<196x128xbf16, #tpu.memory_space<vmem>>, vector<196x128xbf16>
    %cst = arith.constant dense<0.000000e+00> : vector<192x128xf32>
    %2 = tpu.matmul %0, %1, %cst {dimension_numbers = #tpu.dot_dimension_numbers<[1], [0], [0], [1], [0, 0, 1, 1], [], []>} : vector<192x196xbf16>, vector<196x128xbf16>, vector<192x128xf32> -> vector<192x128xf32>
    %3 = arith.truncf %2 : vector<192x128xf32> to vector<192x128xbf16>
    %c0_3 = arith.constant 0 : index
    %c0_4 = arith.constant 0 : index
    %4 = vector.load %arg3[%c0_3, %c0_4] : memref<192x128xbf16, #tpu.memory_space<vmem>>, vector<192x128xbf16>
    tpu.vector_store %arg3[%c0_3, %c0_4], %3 {strides = array<i32>} : memref<192x128xbf16, #tpu.memory_space<vmem>>, vector<192x128xbf16>,
    %cst_5 = arith.constant dense<0.000000e+00> : vector<128xf32>
    %5 = vector.multi_reduction <add>, %2, %cst_5 [0] : vector<192x128xf32> to vector<128xf32>
    %6 = vector.shape_cast %5 : vector<128xf32> to vector<1x128xf32>
    %7 = arith.mulf %2, %2 : vector<192x128xf32>
    %cst_6 = arith.constant dense<0.000000e+00> : vector<128xf32>
    %8 = vector.multi_reduction <add>, %7, %cst_6 [0] : vector<192x128xf32> to vector<128xf32>
    %9 = vector.shape_cast %8 : vector<128xf32> to vector<1x128xf32>
    %10 = tpu.concatenate %6, %9 in 0 : vector<1x128xf32>, vector<1x128xf32> -> vector<2x128xf32>
    %11 = vector.shape_cast %10 : vector<2x128xf32> to vector<1x2x128xf32>
    %c0_7 = arith.constant 0 : index
    %c0_8 = arith.constant 0 : index
    %c0_9 = arith.constant 0 : index
    %12 = vector.load %arg4[%c0_7, %c0_8, %c0_9] : memref<1x2x128xf32, #tpu.memory_space<vmem>>, vector<1x2x128xf32>
    tpu.vector_store %arg4[%c0_7, %c0_8, %c0_9], %11 {strides = array<i32>} : memref<1x2x128xf32, #tpu.memory_space<vmem>>, vector<1x2x128xf32>,
    return
  }
  func.func @transform_0(%arg0: i32) -> (i32, i32) {
    %c0_i32 = arith.constant 0 : i32
    %c0_i32_0 = arith.constant 0 : i32
    return %arg0, %c0_i32 : i32, i32
  }
  func.func @transform_1(%arg0: i32) -> (i32, i32) {
    %c0_i32 = arith.constant 0 : i32
    %c0_i32_0 = arith.constant 0 : i32
    %c0_i32_1 = arith.constant 0 : i32
    return %c0_i32, %c0_i32_0 : i32, i32
  }
  func.func @transform_2(%arg0: i32) -> (i32, i32) {
    %c0_i32 = arith.constant 0 : i32
    %c0_i32_0 = arith.constant 0 : i32
    return %arg0, %c0_i32 : i32, i32
  }
  func.func @transform_3(%arg0: i32) -> (i32, i32, i32) {
    %c0_i32 = arith.constant 0 : i32
    %c0_i32_0 = arith.constant 0 : i32
    %c0_i32_1 = arith.constant 0 : i32
    return %arg0, %c0_i32, %c0_i32_0 : i32, i32, i32
  }
}

</mosaic_0001>

<bundles_post_ra>
// kernel: tpu_custom_call.1
= control target key start
LH: loop header
LB: loop body
LE: loop exit
PB: predicated region body
PF: predicated region fallthrough
CT: control target
= control target key end

     0   :  { %9 = vsyncpa [#allocation3], 0  ;;  %s1218_s0 = inlined_call_operand.hbm [shape: bf16[192,196], index: 0, kind: input, shape index: {}]   ;;  %s1219_s1 = inlined_call_operand.hbm [shape: bf16[196,128], index: 1, kind: input, shape index: {}]   ;;  %s1220_s2 = inlined_call_operand.hbm [shape: bf16[192,128], index: 2, kind: output, shape index: {0}]   ;;  %s1221_s3 = inlined_call_operand.hbm [shape: f32[1,2,128], index: 3, kind: output, shape index: {1}]  }
   0x1   :  { %10 = vsyncpa [#allocation6], 0 }
   0x2   :  { %11 = vsyncpa [#allocation4], 0 }
   0x3   :  { %12 = vsyncpa [#allocation9], 0  ;;  %s1031_s12 = smov [#allocation2]   ;;  %s935_s16 = scalar_lea.hbm %s1218_s0, 3072 }
   0x4   :  { %s18_s13 = sshll.u32 %s1031_s12, 4  ;;  %p936_p0 = scmp.ne.s32.totalorder %s1218_s0, %s935_s16  ;;  %s19_s13 = int_to_ptr.vmem [resolvable:$true] %s18_s13 }
   0x5   :  { %p939_p1 = scmp.lt.u32.totalorder %s935_s16, %s1218_s0 }
   0x7   :  { %p941_p2 = pnand %p939_p1, %p936_p0 }
   0x9   :  { %944 = shalt.err (!%p941_p2)
}
   0xa   :  { %s945_s21 = scalar_lea.vmem %s19_s13, 3072  ;;  %p950_p4 = scmp.lt.s32.totalorder %s19_s13, %s19_s13 }
   0xb   :  { %p946_p3 = scmp.ne.s32.totalorder %s19_s13, %s945_s21  ;;  %p951_p5 = scmp.lt.s32.totalorder %s945_s21, %s945_s21 }
   0xd   :  { %p952_p6 = por %p951_p5, %p950_p4 }
   0xf   :  { %p953_p7 = pnand %p952_p6, %p946_p3 }
  0x11   :  { %956 = shalt.err (!%p953_p7)
}
  0x12   :  { %s1032_s22 = smov 128   ;;  %s1033_s23 = smov 8  }
  0x13   :  { %24 = dma.hbm_to_vmem [thread:$0]  %s1218_s0, 3072, %s19_s13, [#allocation3], %s1032_s22, %s1032_s22, %s1033_s23  }
  0x14   :  { %s1034_s26 = smov [#allocation5]   ;;  %s957_s30 = scalar_lea.hbm %s1219_s1, 1600 }
  0x15   :  { %s30_s27 = sshll.u32 %s1034_s26, 4  ;;  %p958_p8 = scmp.ne.s32.totalorder %s1219_s1, %s957_s30  ;;  %s31_s27 = int_to_ptr.vmem [resolvable:$true] %s30_s27 }
  0x16   :  { %p961_p9 = scmp.lt.u32.totalorder %s957_s30, %s1219_s1 }
  0x18   :  { %p963_p10 = pnand %p961_p9, %p958_p8 }
  0x1a   :  { %966 = shalt.err (!%p963_p10)
}
  0x1b   :  { %s967_s8 = scalar_lea.vmem %s31_s27, 1600  ;;  %p972_p12 = scmp.lt.s32.totalorder %s31_s27, %s31_s27 }
  0x1c   :  { %p968_p11 = scmp.ne.s32.totalorder %s31_s27, %s967_s8  ;;  %p973_p13 = scmp.lt.s32.totalorder %s967_s8, %s967_s8 }
  0x1e   :  { %p974_p0 = por %p973_p13, %p972_p12 }
  0x20   :  { %p975_p1 = pnand %p974_p0, %p968_p11 }
  0x22   :  { %978 = shalt.err (!%p975_p1)
}
  0x23   :  { %s1035_s0 = smov 64   ;;  %s1036_s9 = smov 4  }
  0x24   :  { %36 = dma.hbm_to_vmem [thread:$0]  %s1219_s1, 1600, %s31_s27, [#allocation6], %s1035_s0, %s1035_s0, %s1036_s9  }
  0x25   :  { %1023 = dma.done.wait [#allocation3], 3072  }
  0x26   :  { %1024 = vsyncadd [#allocation3], 4294964224 }
  0x27   :  { %1025 = dma.done.wait [#allocation6], 1600  }
  0x28   :  { %1026 = vsyncadd [#allocation6], 4294965696  ;;  %v1037_v0 = vmov 0   ;;  %v886_v1 = vld [vmem:[#allocation5] sm:$0xff]   ;;  %v887_v2 = vld [vmem:[#allocation5 + $0x8] sm:$0xff]   ;;  %vm276_vm0 = vcmask 556032  }
  0x29   :  { %317 = vmatprep.subr.bf16.mxu0 %v1037_v0  ;;  %851 = vmatprep.subr.bf16.mxu1 %v1037_v0  ;;  %v888_v3 = vld [vmem:[#allocation5 + $0x10] sm:$0xff]   ;;  %v889_v4 = vld [vmem:[#allocation5 + $0x18] sm:$0xff]   ;;  %v901_v5 = vld [vmem:[#allocation2 + $0x4] ss:$8 sps:$4 sm:$0xff]   ;;  %vm313_vm1 = vcmask 1041408   ;;  %s1038_s1 = smov [#allocation7]  }
  0x2a   :  { %318 = vmatpush1.bf16.msra.mxu0 %v886_v1  ;;  %864 = vmatpush1.bf16.msra.mxu1 %v886_v1  ;;  %v890_v6 = vld [vmem:[#allocation5 + $0x20] sm:$0xff]   ;;  %v891_v8 = vld [vmem:[#allocation5 + $0x28] sm:$0xff]   ;;  %v892_v9 = vld [vmem:[#allocation5 + $0x30] sm:$0xff]   ;;  %s656_s12 = sshll.u32 %s1038_s1, 4  ;;  %s657_s12 = int_to_ptr.vmem [resolvable:$true] %s656_s12 }
  0x2b   :  { %319 = vmatprep.subr.bf16.mxu0 %v1037_v0  ;;  %852 = vmatprep.subr.bf16.mxu1 %v1037_v0  ;;  %v910_v7 = vld [vmem:[#allocation2 + $0x64] ss:$8 sps:$4 sm:$0xff]   ;;  %v893_v10 = vld [vmem:[#allocation5 + $0x38] sm:$0xff]   ;;  %v896_v13 = vld [vmem:[#allocation5 + $0x50] sm:$0xff]   ;;  %s979_s13 = scalar_lea.vmem %s657_s12, 1536  ;;  %p984_p3 = scmp.lt.s32.totalorder %s657_s12, %s657_s12 }
  0x2c   :  { %720 = vmatprep.mubr.msk.bf16.mxu0 %vm276_vm0, %v901_v5  ;;  %726 = vmatprep.mubr.msk.bf16.mxu1 %vm276_vm0, %v910_v7  ;;  %v894_v11 = vld [vmem:[#allocation5 + $0x40] sm:$0xff]   ;;  %v895_v12 = vld [vmem:[#allocation5 + $0x48] sm:$0xff]   ;;  %v897_v14 = vld [vmem:[#allocation5 + $0x58] sm:$0xff]   ;;  %p980_p2 = scmp.ne.s32.totalorder %s657_s12, %s979_s13  ;;  %p985_p4 = scmp.lt.s32.totalorder %s979_s13, %s979_s13 }
  0x2d   :  { %v898_v15 = vld [vmem:[#allocation5 + $0x60] ss:$0 sps:$4 sm:$0x33]   ;;  %v902_v19 = vld [vmem:[#allocation2 + $0x14] ss:$8 sps:$4 sm:$0xff]  }
  0x2e   :  { %320 = vmatpush1.bf16.msra.mxu0 %v887_v2  ;;  %865 = vmatpush1.bf16.msra.mxu1 %v887_v2  ;;  %v315_v16 = vsel %vm313_vm1, %v898_v15, 0  ;;  %v899_v17 = vld [vmem:[#allocation2] ss:$8 sps:$4 sm:$0xff]   ;;  %v914_v20 = vld [vmem:[#allocation2 + $0x74] ss:$8 sps:$4 sm:$0xff]   ;;  %p986_p5 = por %p985_p4, %p984_p3 }
  0x2f   :  { %321 = vmatprep.subr.bf16.mxu0 %v1037_v0  ;;  %853 = vmatprep.subr.bf16.mxu1 %v1037_v0  ;;  %v908_v18 = vld [vmem:[#allocation2 + $0x60] ss:$8 sps:$4 sm:$0xff]   ;;  %v904_v21 = vld [vmem:[#allocation2 + $0x10] ss:$8 sps:$4 sm:$0xff]   ;;  %v905_v23 = vld [vmem:[#allocation2 + $0x24] ss:$8 sps:$4 sm:$0xff]  }
  0x30   :  { %v916_v22 = vld [vmem:[#allocation2 + $0x70] ss:$8 sps:$4 sm:$0xff]   ;;  %v920_v24 = vld [vmem:[#allocation2 + $0x84] ss:$8 sps:$4 sm:$0xff]   ;;  %v907_v25 = vld [vmem:[#allocation2 + $0x20] ss:$8 sps:$4 sm:$0xff]   ;;  %p987_p6 = pnand %p986_p5, %p980_p2 }
  0x31   :  { %v922_v26 = vld [vmem:[#allocation2 + $0x80] ss:$8 sps:$4 sm:$0xff]   ;;  %v911_v27 = vld [vmem:[#allocation2 + $0x34] ss:$8 sps:$4 sm:$0xff]   ;;  %v913_v29 = vld [vmem:[#allocation2 + $0x30] ss:$8 sps:$4 sm:$0xff]  }
  0x32   :  { %322 = vmatpush1.bf16.msra.mxu0 %v888_v3  ;;  %866 = vmatpush1.bf16.msra.mxu1 %v888_v3  ;;  %v926_v28 = vld [vmem:[#allocation2 + $0x94] ss:$8 sps:$4 sm:$0xff]   ;;  %v928_v30 = vld [vmem:[#allocation2 + $0x90] ss:$8 sps:$4 sm:$0xff]   ;;  %v917_v31 = vld [vmem:[#allocation2 + $0x44] ss:$8 sps:$4 sm:$0xff]  }
  0x33   :  { %323 = vmatprep.subr.bf16.mxu0 %v1037_v0  ;;  %854 = vmatprep.subr.bf16.mxu1 %v1037_v0  ;;  %v929_v32 = vld [vmem:[#allocation2 + $0xa4] ss:$8 sps:$4 sm:$0xff]   ;;  %v919_v33 = vld [vmem:[#allocation2 + $0x40] ss:$8 sps:$4 sm:$0xff]   ;;  %v923_v35 = vld [vmem:[#allocation2 + $0x54] ss:$8 sps:$4 sm:$0xff]  }
  0x34   :  { %v931_v34 = vld [vmem:[#allocation2 + $0xa0] ss:$8 sps:$4 sm:$0xff]   ;;  %v932_v36 = vld [vmem:[#allocation2 + $0xb4] ss:$8 sps:$4 sm:$0xff]   ;;  %v925_v37 = vld [vmem:[#allocation2 + $0x50] ss:$8 sps:$4 sm:$0xff]  }
  0x35   :  { %v934_v38 = vld [vmem:[#allocation2 + $0xb0] ss:$8 sps:$4 sm:$0xff]  }
  0x36   :  { %324 = vmatpush1.bf16.msra.mxu0 %v889_v4  ;;  %867 = vmatpush1.bf16.msra.mxu1 %v889_v4 }
  0x37   :  { %325 = vmatprep.subr.bf16.mxu0 %v1037_v0  ;;  %855 = vmatprep.subr.bf16.mxu1 %v1037_v0 }
  0x3a   :  { %326 = vmatpush1.bf16.msra.mxu0 %v890_v6  ;;  %868 = vmatpush1.bf16.msra.mxu1 %v890_v6 }
  0x3b   :  { %327 = vmatprep.subr.bf16.mxu0 %v1037_v0  ;;  %856 = vmatprep.subr.bf16.mxu1 %v1037_v0 }
  0x3e   :  { %328 = vmatpush1.bf16.msra.mxu0 %v891_v8  ;;  %869 = vmatpush1.bf16.msra.mxu1 %v891_v8 }
  0x3f   :  { %329 = vmatprep.subr.bf16.mxu0 %v1037_v0  ;;  %857 = vmatprep.subr.bf16.mxu1 %v1037_v0 }
  0x42   :  { %330 = vmatpush1.bf16.msra.mxu0 %v892_v9  ;;  %870 = vmatpush1.bf16.msra.mxu1 %v892_v9 }
  0x43   :  { %331 = vmatprep.subr.bf16.mxu0 %v1037_v0  ;;  %858 = vmatprep.subr.bf16.mxu1 %v1037_v0 }
  0x46   :  { %332 = vmatpush1.bf16.msra.mxu0 %v893_v10  ;;  %871 = vmatpush1.bf16.msra.mxu1 %v893_v10 }
  0x47   :  { %333 = vmatprep.subr.bf16.mxu0 %v1037_v0  ;;  %859 = vmatprep.subr.bf16.mxu1 %v1037_v0 }
  0x4a   :  { %334 = vmatpush1.bf16.msra.mxu0 %v894_v11  ;;  %872 = vmatpush1.bf16.msra.mxu1 %v894_v11 }
  0x4b   :  { %335 = vmatprep.subr.bf16.mxu0 %v1037_v0  ;;  %860 = vmatprep.subr.bf16.mxu1 %v1037_v0 }
  0x4e   :  { %336 = vmatpush1.bf16.msra.mxu0 %v895_v12  ;;  %873 = vmatpush1.bf16.msra.mxu1 %v895_v12 }
  0x4f   :  { %337 = vmatprep.subr.bf16.mxu0 %v1037_v0  ;;  %861 = vmatprep.subr.bf16.mxu1 %v1037_v0 }
  0x52   :  { %338 = vmatpush1.bf16.msra.mxu0 %v896_v13  ;;  %874 = vmatpush1.bf16.msra.mxu1 %v896_v13 }
  0x53   :  { %339 = vmatprep.subr.bf16.mxu0 %v1037_v0  ;;  %862 = vmatprep.subr.bf16.mxu1 %v1037_v0 }
  0x56   :  { %340 = vmatpush1.bf16.msra.mxu0 %v897_v14  ;;  %875 = vmatpush1.bf16.msra.mxu1 %v897_v14 }
  0x57   :  { %341 = vmatprep.subr.bf16.mxu0 %v1037_v0  ;;  %863 = vmatprep.subr.bf16.mxu1 %v1037_v0 }
  0x5a   :  { %342 = vmatpush1.bf16.msra.mxu0 %v315_v16  ;;  %876 = vmatpush1.bf16.msra.mxu1 %v315_v16 }
  0x5d   :  { %350 = vmatmul.mubr.bf16.vlgmr.msra.gmra.mrb[0].mxu0 %v899_v17  ;;  %398 = vmatmul.mubr.bf16.vlgmr.msra.gmra.mrb[0].mxu1 %v908_v18 }
  0x5e   :  { %721 = vmatprep.mubr.msk.bf16.mxu0 %vm276_vm0, %v902_v19  ;;  %727 = vmatprep.mubr.msk.bf16.mxu1 %vm276_vm0, %v914_v20 }
  0x65   :  { %358 = vmatmul.mubr.bf16.gmra.mrb[4].mxu0 %v904_v21  ;;  %406 = vmatmul.mubr.bf16.gmra.mrb[4].mxu1 %v916_v22 }
  0x66   :  { %722 = vmatprep.mubr.msk.bf16.mxu0 %vm276_vm0, %v905_v23  ;;  %728 = vmatprep.mubr.msk.bf16.mxu1 %vm276_vm0, %v920_v24 }
  0x6d   :  { %366 = vmatmul.mubr.bf16.gmra.mrb[8].mxu0 %v907_v25  ;;  %414 = vmatmul.mubr.bf16.gmra.mrb[8].mxu1 %v922_v26 }
  0x6e   :  { %723 = vmatprep.mubr.msk.bf16.mxu0 %vm276_vm0, %v911_v27  ;;  %729 = vmatprep.mubr.msk.bf16.mxu1 %vm276_vm0, %v926_v28 }
  0x75   :  { %374 = vmatmul.mubr.bf16.gmra.mrb[12].mxu0 %v913_v29  ;;  %422 = vmatmul.mubr.bf16.gmra.mrb[12].mxu1 %v928_v30 }
  0x76   :  { %724 = vmatprep.mubr.msk.bf16.mxu0 %vm276_vm0, %v917_v31  ;;  %730 = vmatprep.mubr.msk.bf16.mxu1 %vm276_vm0, %v929_v32 }
  0x7d   :  { %382 = vmatmul.mubr.bf16.gmra.mrb[16].mxu0 %v919_v33  ;;  %430 = vmatmul.mubr.bf16.gmra.mrb[16].mxu1 %v931_v34 }
  0x7e   :  { %725 = vmatprep.mubr.msk.bf16.mxu0 %vm276_vm0, %v923_v35  ;;  %731 = vmatprep.mubr.msk.bf16.mxu1 %vm276_vm0, %v932_v36 }
  0x85   :  { %390 = vmatmul.mubr.bf16.gmra.mrb[20].mxu0 %v925_v37  ;;  %438 = vmatmul.mubr.bf16.gmra.mrb[20].mxu1 %v934_v38 }
 0x130   :  { %v351_v39 = vpop.f32.mrb[0].mxu0  ;;  %v1125_v40 = vpop.f32.mrb[0].mxu1 }
 0x131   :  { %v353_v41 = vpop.f32.mrb[1].mxu0  ;;  %v401_v42 = vpop.f32.mrb[1].mxu1  ;;  %v595_v43 = vmul.f32 %v351_v39, %v351_v39 }
 0x132   :  { %v354_v44 = vpop.f32.mrb[2].mxu0  ;;  %v1127_v45 = vpop.f32.mrb[2].mxu1 }
 0x133   :  { %v783_v46 = vpack.c.bf16 %v354_v44, %v351_v39  ;;  %v566_v47 = vadd.f32 %v354_v44, %v351_v39  ;;  %v596_v48 = vmul.f32 %v354_v44, %v354_v44  ;;  %v356_v49 = vpop.f32.mrb[3].mxu0  ;;  %v813_v50 = vpack.c.bf16 %v1127_v45, %v1125_v40  ;;  %v404_v51 = vpop.f32.mrb[3].mxu1 }
 0x135   :  { %784 = vst [vmem:[#allocation7] sm:$0xff] %v783_v46   ;;  %v619_v52 = vadd.f32 %v596_v48, %v595_v43  ;;  %845 = vst [vmem:[#allocation7 + $0x30] sm:$0xff] %v813_v50  }
 0x138   :  { %v359_v53 = vpop.f32.mrb[4].mxu0  ;;  %v1131_v54 = vpop.f32.mrb[4].mxu1 }
 0x139   :  { %v567_v55 = vadd.f32 %v566_v47, %v359_v53  ;;  %v597_v56 = vmul.f32 %v359_v53, %v359_v53  ;;  %v361_v57 = vpop.f32.mrb[5].mxu0  ;;  %v409_v58 = vpop.f32.mrb[5].mxu1 }
 0x13a   :  { %v362_v59 = vpop.f32.mrb[6].mxu0  ;;  %v1133_v60 = vpop.f32.mrb[6].mxu1 }
 0x13b   :  { %v620_v61 = vadd.f32 %v619_v52, %v597_v56  ;;  %v788_v62 = vpack.c.bf16 %v362_v59, %v359_v53  ;;  %v568_v63 = vadd.f32 %v567_v55, %v362_v59  ;;  %v598_v0 = vmul.f32 %v362_v59, %v362_v59  ;;  %v364_v1 = vpop.f32.mrb[7].mxu0  ;;  %v412_v2 = vpop.f32.mrb[7].mxu1 }
 0x13c   :  { %v818_v3 = vpack.c.bf16 %v1133_v60, %v1131_v54 }
 0x13d   :  { %840 = vst [vmem:[#allocation7 + $0x8] sm:$0xff] %v788_v62   ;;  %v621_v4 = vadd.f32 %v620_v61, %v598_v0 }
 0x13e   :  { %846 = vst [vmem:[#allocation7 + $0x38] sm:$0xff] %v818_v3  }
 0x140   :  { %v367_v5 = vpop.f32.mrb[8].mxu0  ;;  %v1137_v6 = vpop.f32.mrb[8].mxu1 }
 0x141   :  { %v569_v7 = vadd.f32 %v568_v63, %v367_v5  ;;  %v599_v8 = vmul.f32 %v367_v5, %v367_v5  ;;  %v369_v9 = vpop.f32.mrb[9].mxu0  ;;  %v417_v10 = vpop.f32.mrb[9].mxu1 }
 0x142   :  { %v370_v11 = vpop.f32.mrb[10].mxu0  ;;  %v1139_v12 = vpop.f32.mrb[10].mxu1  ;;  %v607_v9 = vmul.f32 %v1125_v40, %v1125_v40 }
 0x143   :  { %v622_v13 = vadd.f32 %v621_v4, %v599_v8  ;;  %v793_v14 = vpack.c.bf16 %v370_v11, %v367_v5  ;;  %v570_v15 = vadd.f32 %v569_v7, %v370_v11  ;;  %v600_v16 = vmul.f32 %v370_v11, %v370_v11  ;;  %v372_v17 = vpop.f32.mrb[11].mxu0  ;;  %v420_v18 = vpop.f32.mrb[11].mxu1 }
 0x144   :  { %v823_v19 = vpack.c.bf16 %v1139_v12, %v1137_v6 }
 0x145   :  { %841 = vst [vmem:[#allocation7 + $0x10] sm:$0xff] %v793_v14   ;;  %v623_v20 = vadd.f32 %v622_v13, %v600_v16  ;;  %v608_v13 = vmul.f32 %v1127_v45, %v1127_v45 }
 0x146   :  { %847 = vst [vmem:[#allocation7 + $0x40] sm:$0xff] %v823_v19  }
 0x148   :  { %v375_v21 = vpop.f32.mrb[12].mxu0  ;;  %v1143_v22 = vpop.f32.mrb[12].mxu1 }
 0x149   :  { %v571_v23 = vadd.f32 %v570_v15, %v375_v21  ;;  %v601_v24 = vmul.f32 %v375_v21, %v375_v21  ;;  %v377_v25 = vpop.f32.mrb[13].mxu0  ;;  %v425_v26 = vpop.f32.mrb[13].mxu1 }
 0x14a   :  { %v378_v27 = vpop.f32.mrb[14].mxu0  ;;  %v1145_v28 = vpop.f32.mrb[14].mxu1 }
 0x14b   :  { %v624_v29 = vadd.f32 %v623_v20, %v601_v24  ;;  %v798_v30 = vpack.c.bf16 %v378_v27, %v375_v21  ;;  %v572_v31 = vadd.f32 %v571_v23, %v378_v27  ;;  %v602_v32 = vmul.f32 %v378_v27, %v378_v27  ;;  %v380_v33 = vpop.f32.mrb[15].mxu0  ;;  %v428_v34 = vpop.f32.mrb[15].mxu1 }
 0x14c   :  { %v828_v35 = vpack.c.bf16 %v1145_v28, %v1143_v22 }
 0x14d   :  { %842 = vst [vmem:[#allocation7 + $0x18] sm:$0xff] %v798_v30   ;;  %v625_v36 = vadd.f32 %v624_v29, %v602_v32 }
 0x14e   :  { %848 = vst [vmem:[#allocation7 + $0x48] sm:$0xff] %v828_v35  }
 0x150   :  { %v383_v37 = vpop.f32.mrb[16].mxu0  ;;  %v1149_v38 = vpop.f32.mrb[16].mxu1 }
 0x151   :  { %v573_v39 = vadd.f32 %v572_v31, %v383_v37  ;;  %v603_v41 = vmul.f32 %v383_v37, %v383_v37  ;;  %v385_v42 = vpop.f32.mrb[17].mxu0  ;;  %v433_v43 = vpop.f32.mrb[17].mxu1 }
 0x152   :  { %v386_v44 = vpop.f32.mrb[18].mxu0  ;;  %v1151_v46 = vpop.f32.mrb[18].mxu1 }
 0x153   :  { %v626_v47 = vadd.f32 %v625_v36, %v603_v41  ;;  %v803_v48 = vpack.c.bf16 %v386_v44, %v383_v37  ;;  %v574_v49 = vadd.f32 %v573_v39, %v386_v44  ;;  %v604_v50 = vmul.f32 %v386_v44, %v386_v44  ;;  %v388_v51 = vpop.f32.mrb[19].mxu0  ;;  %v436_v52 = vpop.f32.mrb[19].mxu1 }
 0x154   :  { %v833_v53 = vpack.c.bf16 %v1151_v46, %v1149_v38 }
 0x155   :  { %843 = vst [vmem:[#allocation7 + $0x20] sm:$0xff] %v803_v48   ;;  %v627_v55 = vadd.f32 %v626_v47, %v604_v50 }
 0x156   :  { %849 = vst [vmem:[#allocation7 + $0x50] sm:$0xff] %v833_v53  }
 0x158   :  { %v391_v56 = vpop.f32.mrb[20].mxu0  ;;  %v1155_v57 = vpop.f32.mrb[20].mxu1 }
 0x159   :  { %v575_v58 = vadd.f32 %v574_v49, %v391_v56  ;;  %v605_v59 = vmul.f32 %v391_v56, %v391_v56  ;;  %v393_v61 = vpop.f32.mrb[21].mxu0  ;;  %v441_v62 = vpop.f32.mrb[21].mxu1 }
 0x15a   :  { %v394_v63 = vpop.f32.mrb[22].mxu0  ;;  %v442_v0 = vpop.f32.mrb[22].mxu1 }
 0x15b   :  { %v628_v1 = vadd.f32 %v627_v55, %v605_v59  ;;  %v808_v2 = vpack.c.bf16 %v394_v63, %v391_v56  ;;  %v576_v3 = vadd.f32 %v575_v58, %v394_v63  ;;  %v606_v4 = vmul.f32 %v394_v63, %v394_v63  ;;  %v396_v5 = vpop.f32.mrb[23].mxu0  ;;  %v444_v7 = vpop.f32.mrb[23].mxu1 }
 0x15c   :  { %v838_v8 = vpack.c.bf16 %v442_v0, %v1155_v57 }
 0x15d   :  { %844 = vst [vmem:[#allocation7 + $0x28] sm:$0xff] %v808_v2   ;;  %v577_v10 = vadd.f32 %v576_v3, %v1125_v40  ;;  %v629_v11 = vadd.f32 %v628_v1, %v606_v4 }
 0x15e   :  { %850 = vst [vmem:[#allocation7 + $0x58] sm:$0xff] %v838_v8  }
 0x15f   :  { %v578_v14 = vadd.f32 %v577_v10, %v1127_v45  ;;  %v630_v15 = vadd.f32 %v629_v11, %v607_v9 }
 0x160   :  { %990 = shalt.err (!%p987_p6)
}
 0x161   :  { %s991_s16 = scalar_lea.hbm %s1220_s2, 1536 }
 0x162   :  { %p992_p7 = scmp.ne.s32.totalorder %s1220_s2, %s991_s16  ;;  %p995_p8 = scmp.lt.u32.totalorder %s991_s16, %s1220_s2 }
 0x164   :  { %p997_p9 = pnand %p995_p8, %p992_p7 }
 0x166   :  { %1000 = shalt.err (!%p997_p9)
}
 0x167   :  { %662 = dma.vmem_to_hbm [thread:$0]  %s657_s12, 1536, %s1220_s2, [#allocation4], %s1035_s0, %s1035_s0, %s1036_s9   ;;  %v609_v40 = vmul.f32 %v1131_v54, %v1131_v54  ;;  %v579_v45 = vadd.f32 %v578_v14, %v1131_v54  ;;  %v631_v16 = vadd.f32 %v630_v15, %v608_v13  ;;  %v610_v17 = vmul.f32 %v1133_v60, %v1133_v60 }
 0x168   :  { %v611_v20 = vmul.f32 %v1137_v6, %v1137_v6  ;;  %v612_v24 = vmul.f32 %v1139_v12, %v1139_v12  ;;  %v613_v27 = vmul.f32 %v1143_v22, %v1143_v22  ;;  %v614_v31 = vmul.f32 %v1145_v28, %v1145_v28  ;;  %s1039_s2 = smov [#allocation8]  }
 0x169   :  { %v632_v18 = vadd.f32 %v631_v16, %v609_v40  ;;  %v580_v19 = vadd.f32 %v579_v45, %v1133_v60  ;;  %v615_v33 = vmul.f32 %v1149_v38, %v1149_v38  ;;  %v616_v35 = vmul.f32 %v1151_v46, %v1151_v46  ;;  %s669_s23 = sshll.u32 %s1039_s2, 4  ;;  %s670_s23 = int_to_ptr.vmem [resolvable:$true] %s669_s23 }
 0x16a   :  { %v618_v41 = vmul.f32 %v442_v0, %v442_v0  ;;  %vm648_vm2 = vcmask 1040384   ;;  %s1001_s24 = scalar_lea.vmem %s670_s23, 32  ;;  %p1006_p11 = scmp.lt.s32.totalorder %s670_s23, %s670_s23 }
 0x16b   :  { %v581_v21 = vadd.f32 %v580_v19, %v1137_v6  ;;  %v633_v23 = vadd.f32 %v632_v18, %v610_v17  ;;  %p1002_p10 = scmp.ne.s32.totalorder %s670_s23, %s1001_s24  ;;  %p1007_p12 = scmp.lt.s32.totalorder %s1001_s24, %s1001_s24 }
 0x16d   :  { %v582_v25 = vadd.f32 %v581_v21, %v1139_v12  ;;  %v634_v26 = vadd.f32 %v633_v23, %v611_v20  ;;  %p1008_p13 = por %p1007_p12, %p1006_p11 }
 0x16f   :  { %v583_v54 = vadd.f32 %v582_v25, %v1143_v22  ;;  %v635_v29 = vadd.f32 %v634_v26, %v612_v24  ;;  %v617_v22 = vmul.f32 %v1155_v57, %v1155_v57  ;;  %p1009_p0 = pnand %p1008_p13, %p1002_p10 }
 0x171   :  { %v636_v30 = vadd.f32 %v635_v29, %v613_v27  ;;  %v584_v60 = vadd.f32 %v583_v54, %v1145_v28 }
 0x173   :  { %v637_v6 = vadd.f32 %v636_v30, %v614_v31  ;;  %v585_v32 = vadd.f32 %v584_v60, %v1149_v38 }
 0x175   :  { %v638_v12 = vadd.f32 %v637_v6, %v615_v33  ;;  %v586_v34 = vadd.f32 %v585_v32, %v1151_v46 }
 0x177   :  { %v639_v36 = vadd.f32 %v638_v12, %v616_v35  ;;  %v587_v37 = vadd.f32 %v586_v34, %v1155_v57 }
 0x179   :  { %v640_v39 = vadd.f32 %v639_v36, %v617_v22  ;;  %v588_v28 = vadd.f32 %v587_v37, %v442_v0 }
 0x17b   :  { %v589_v42 = vrot.slane %v588_v28, 4  ;;  %v641_v43 = vadd.f32 %v640_v39, %v618_v41 }
 0x17d   :  { %v590_v44 = vadd.f32 %v589_v42, %v588_v28  ;;  %v642_v47 = vrot.slane %v641_v43, 4 }
 0x17f   :  { %v591_v38 = vrot.slane %v590_v44, 2  ;;  %v643_v48 = vadd.f32 %v642_v47, %v641_v43 }
 0x181   :  { %v592_v49 = vadd.f32 %v591_v38, %v590_v44  ;;  %v644_v50 = vrot.slane %v643_v48, 2 }
 0x183   :  { %v593_v51 = vrot.slane %v592_v49, 1  ;;  %v645_v52 = vadd.f32 %v644_v50, %v643_v48 }
 0x185   :  { %v646_v46 = vrot.slane %v645_v52, 1  ;;  %v594_v53 = vadd.f32 %v593_v51, %v592_v49 }
 0x187   :  { %v647_v55 = vadd.f32 %v646_v46, %v645_v52 }
 0x189   :  { %v649_v56 = vsel %vm648_vm2, %v594_v53, %v647_v55 }
 0x18a   :  { %650 = vst [vmem:[#allocation8] sm:$0x3] %v649_v56 }
 0x18b   :  { %1012 = shalt.err (!%p1009_p0)
}
 0x18c   :  { %s1013_s27 = scalar_lea.hbm %s1221_s3, 32 }
 0x18d   :  { %p1014_p1 = scmp.ne.s32.totalorder %s1221_s3, %s1013_s27  ;;  %p1017_p2 = scmp.lt.u32.totalorder %s1013_s27, %s1221_s3 }
 0x18f   :  { %p1019_p3 = pnand %p1017_p2, %p1014_p1 }
 0x191   :  { %1022 = shalt.err (!%p1019_p3)
}
 0x192   :  { %672 = dma.vmem_to_hbm [thread:$0]  %s670_s23, 32, %s1221_s3, [#allocation9]  }
 0x193   :  { %1027 = dma.done.wait [#allocation4], 1536  }
 0x194   :  { %1028 = vsyncadd [#allocation4], 4294965760 }
 0x195   :  { %1029 = dma.done.wait [#allocation9], 32  }
 0x196   :  { %1030 = vsyncadd [#allocation9], 4294967264 }
 0x197   :  { %679 = vsyncpa [#allocation3], 1 }
 0x198   :  { %680 = vsyncpa [#allocation6], 1 }
 0x199   :  { %681 = vsyncpa [#allocation4], 1 }
 0x19a   :  { %682 = vsyncpa [#allocation9], 1 }

</bundles_post_ra>
